<compile_context>
chip_gen: v7x
topology: tpu7x:2x2x1
jax: 0.10.0
libtpu: 0.0.40
codegen_flags: <defaults>
</compile_context>

<pallas_src>
import functools

import jax
import jax.numpy as jnp
from jax.experimental import pallas as pl
from jax.experimental.pallas import tpu as pltpu


def _distill_kl_kernel(ys_ref, yt_ref, out_ref, *, T, t, n_valid, block_rows,
                       need_mask):
    """One batch tile: partial sum over rows of KL(p_t||p_s) * teacher_entropy."""
    i = pl.program_id(0)

    ys = ys_ref[...].astype(jnp.float32)
    yt = yt_ref[...].astype(jnp.float32)

    inv_T = 1.0 / T

    # Student: only the per-row log-partition log(ss) is needed.
    zs = (ys - jnp.max(ys, axis=1, keepdims=True)) * inv_T            # [tb, C]
    log_ss = jnp.log(jnp.sum(jnp.exp(zs), axis=1, keepdims=True))     # [tb, 1]

    # Teacher at temperature T (row-max shared with the t-softmax below,
    # since max(y/T) = max(y)/T).
    yt_max = jnp.max(yt, axis=1, keepdims=True)
    zt = (yt - yt_max) * inv_T                                        # [tb, C]
    et = jnp.exp(zt)                                                  # [tb, C]
    st = jnp.sum(et, axis=1, keepdims=True)                           # [tb, 1]
    a_tz = jnp.sum(et * zt, axis=1, keepdims=True)                    # [tb, 1]
    a_ts = jnp.sum(et * zs, axis=1, keepdims=True)                    # [tb, 1]
    inv_st = pl.reciprocal(st, approx=False)                          # per-row
    log_st = jnp.log(st)

    # KL(p_t || p_s) per row via log-sum-exp algebra (no pt/log_ps/log_pt
    # [tb, C] temporaries):  kl = (1/st)*sum(et*(zt - zs)) + log(ss) - log(st)
    kl_row = (a_tz - a_ts) * inv_st + log_ss - log_st                 # [tb, 1]

    # Teacher entropy at temperature t: ent = log(st2) - (1/st2)*sum(et2*zt2).
    # Note: the reference's log(clamp(p, 1e-10)) is replaced by exact
    # log-softmax algebra; they differ only for fully-underflowed
    # probabilities, where both contribute ~0 to the entropy.
    if T == t:
        ent = log_st - a_tz * inv_st
    else:
        zt2 = (yt - yt_max) * (1.0 / t)
        et2 = jnp.exp(zt2)
        st2 = jnp.sum(et2, axis=1, keepdims=True)
        a_t2 = jnp.sum(et2 * zt2, axis=1, keepdims=True)
        ent = jnp.log(st2) - a_t2 * pl.reciprocal(st2, approx=False)

    per_row = kl_row * ent                                            # [tb, 1]

    if need_mask:
        # The last batch block may extend past B (no wrapper-side padding);
        # zero those rows AFTER all per-row reductions so any undefined data
        # (possibly NaN/Inf) in the ragged tail cannot leak into the sum.
        row = (jax.lax.broadcasted_iota(jnp.int32, (block_rows, 1), 0)
               + i * block_rows)
        per_row = jnp.where(row < n_valid, per_row, 0.0)

    # Lane-dense output block; wrapper reads [tile, 0, 0].
    out_ref[...] = jnp.broadcast_to(jnp.sum(per_row), (1, 8, 128)).astype(
        jnp.float32)


def distill_kl(y_s, y_t, entropy=None, *, T=4.0, t=4.0, block_rows=None):
    """Pallas implementation of DistillKL(T).forward(y_s, y_t, entropy, t).

    `entropy` is accepted for API parity but (as in the PyTorch module) it is
    ignored and recomputed from y_t. Inputs may be f32 or bf16 (bf16 halves
    HBM->VMEM traffic); all math runs in f32 inside the kernel.
    """
    del entropy  # recomputed from y_t, exactly like the PyTorch module
    B, C = y_s.shape
    T = float(T)
    t = float(t)

    # --- batch-tile size: dtype- and VMEM-aware ------------------------------
    # Per-row bytes = 2 pipeline buffers per input (BlockSpec double-buffering)
    # plus the live f32 intermediates inside the kernel body.
    n_interm = 6 if T == t else 8
    bytes_per_row = (2 * C * (y_s.dtype.itemsize + y_t.dtype.itemsize)
                     + n_interm * C * 4)
    vmem_budget = 12 * 1024 * 1024          # < scoped default on v5e/v6e/v7x
    tb = int(max(8, (vmem_budget // bytes_per_row) // 8 * 8))
    tb = min(tb, 4096)                      # amortizes ~0.35us per-step cost
    if block_rows is not None:
        tb = min(tb, max(8, (int(block_rows) // 8) * 8))

    if B < 16:
        # Tiny batch: one full-extent block (also covers B not multiple of 8).
        tb = B
        num_tiles = 1
    else:
        # Always >= 2 tiles: lets the "parallel" axis shard across v7x's two
        # TensorCores and keeps the input DMA pipeline overlapped with compute.
        half = -(-B // 2)                   # ceil(B / 2)
        half_aligned = -(-half // 8) * 8    # round up to sublane multiple
        tb = max(8, min(tb, half_aligned))
        num_tiles = pl.cdiv(B, tb)

    need_mask = (num_tiles * tb) != B       # ragged last block, masked in-kernel

    kernel = functools.partial(
        _distill_kl_kernel, T=T, t=t, n_valid=B, block_rows=tb,
        need_mask=need_mask)

    n_exp = 2 if T == t else 3
    cost = pl.CostEstimate(
        flops=12 * B * C,
        transcendentals=n_exp * B * C,
        bytes_accessed=B * C * (y_s.dtype.itemsize + y_t.dtype.itemsize)
        + num_tiles * 8 * 128 * 4,
    )

    partials = pl.pallas_call(
        kernel,
        out_shape=jax.ShapeDtypeStruct((num_tiles, 8, 128), jnp.float32),
        grid=(num_tiles,),
        in_specs=[
            pl.BlockSpec((tb, C), lambda i: (i, 0)),
            pl.BlockSpec((tb, C), lambda i: (i, 0)),
        ],
        out_specs=pl.BlockSpec((1, 8, 128), lambda i: (i, 0, 0)),
        compiler_params=pltpu.CompilerParams(
            dimension_semantics=("parallel",),
            vmem_limit_bytes=32 * 1024 * 1024),
        cost_estimate=cost,
    )(y_s, y_t)

    # Mean over the true batch (padded rows already zeroed), times T^2.
    return jnp.sum(partials[:, 0, 0]) * (T * T / B)


def _distill_kl_ref(y_s, y_t, T=4.0, t=4.0):
    # Pure-JAX reference mirroring the PyTorch forward.
    p_s = jax.nn.softmax(y_s / T, axis=1)
    p_t = jax.nn.softmax(y_t / T, axis=1)
    kl = p_t * (jnp.log(p_t) - jnp.log(p_s))
    _p_t = jax.nn.softmax(y_t / t, axis=1)
    ent = -jnp.sum(_p_t * jnp.log(jnp.maximum(_p_t, 1e-10)), axis=1)
    return jnp.mean(jnp.sum(kl, axis=1) * ent) * T ** 2


if __name__ == "__main__":
    key = jax.random.PRNGKey(0)
    k1, k2, k3, k4 = jax.random.split(key, 4)

    # Test 1: CIFAR-100-style small shape; single tile, T == t (reuse path).
    B1, C1 = 8, 100
    y_s1 = jax.random.normal(k1, (B1, C1), dtype=jnp.float32)
    y_t1 = jax.random.normal(k2, (B1, C1), dtype=jnp.float32)
    ent_unused = jnp.zeros((B1,), dtype=jnp.float32)  # ignored, as in PyTorch
    loss1 = jax.block_until_ready(
        distill_kl(y_s1, y_t1, ent_unused, T=4.0, t=4.0))
    ref1 = _distill_kl_ref(y_s1, y_t1, T=4.0, t=4.0)
    assert jnp.allclose(loss1, ref1, rtol=1e-4, atol=1e-5), (loss1, ref1)

    # Test 2: explicit small tiles -> 3 tiles, ragged last block, T != t.
    B2, C2 = 40, 100
    y_s2 = jax.random.normal(k3, (B2, C2), dtype=jnp.float32)
    y_t2 = jax.random.normal(k4, (B2, C2), dtype=jnp.float32)
    loss2 = jax.block_until_ready(
        distill_kl(y_s2, y_t2, None, T=4.0, t=2.0, block_rows=16))
    ref2 = _distill_kl_ref(y_s2, y_t2, T=4.0, t=2.0)
    assert jnp.allclose(loss2, ref2, rtol=1e-4, atol=1e-5), (loss2, ref2)

    # Test 3: auto tiling (>= 2 tiles, no wrapper padding, ragged mask), T == t.
    loss3 = jax.block_until_ready(distill_kl(y_s2, y_t2, None, T=4.0, t=4.0))
    ref3 = _distill_kl_ref(y_s2, y_t2, T=4.0, t=4.0)
    assert jnp.allclose(loss3, ref3, rtol=1e-4, atol=1e-5), (loss3, ref3)

    print("KERNEL_OK")
</pallas_src>

<mosaic_0001>
module attributes {stable_mosaic.version = 11 : i64} {
  func.func @_distill_kl_kernel(%arg0: i32, %arg1: memref<8x100xf32, #tpu.memory_space<vmem>>, %arg2: memref<8x100xf32, #tpu.memory_space<vmem>>, %arg3: memref<1x8x128xf32, #tpu.memory_space<vmem>>) attributes {dimension_semantics = [#tpu.dimension_semantics<parallel>], iteration_bounds = array<i64: 1>, scalar_prefetch = 0 : i64, scratch_operands = 0 : i64, tpu.core_type = #tpu.core_type<tc>, window_params = [{transform_indices = @transform_0, window_bounds = array<i64: 8, 100>}, {transform_indices = @transform_1, window_bounds = array<i64: 8, 100>}, {transform_indices = @transform_2, window_bounds = array<i64: 1, 8, 128>}]} {
    %c0 = arith.constant 0 : index
    %c0_0 = arith.constant 0 : index
    %0 = vector.load %arg1[%c0, %c0_0] : memref<8x100xf32, #tpu.memory_space<vmem>>, vector<8x100xf32>
    %c0_1 = arith.constant 0 : index
    %c0_2 = arith.constant 0 : index
    %1 = vector.load %arg2[%c0_1, %c0_2] : memref<8x100xf32, #tpu.memory_space<vmem>>, vector<8x100xf32>
    %cst = arith.constant dense<0xFF800000> : vector<8xf32>
    %2 = vector.multi_reduction <maximumf>, %0, %cst [1] : vector<8x100xf32> to vector<8xf32>
    %3 = vector.shape_cast %2 : vector<8xf32> to vector<8x1xf32>
    %4 = vector.broadcast %3 : vector<8x1xf32> to vector<8x100xf32>
    %5 = arith.subf %0, %4 : vector<8x100xf32>
    %cst_3 = arith.constant 2.500000e-01 : f32
    %6 = vector.broadcast %cst_3 : f32 to vector<8x100xf32>
    %7 = arith.mulf %5, %6 : vector<8x100xf32>
    %8 = math.exp %7 : vector<8x100xf32>
    %cst_4 = arith.constant dense<0.000000e+00> : vector<8xf32>
    %9 = vector.multi_reduction <add>, %8, %cst_4 [1] : vector<8x100xf32> to vector<8xf32>
    %10 = vector.shape_cast %9 : vector<8xf32> to vector<8x1xf32>
    %11 = math.log %10 : vector<8x1xf32>
    %cst_5 = arith.constant dense<0xFF800000> : vector<8xf32>
    %12 = vector.multi_reduction <maximumf>, %1, %cst_5 [1] : vector<8x100xf32> to vector<8xf32>
    %13 = vector.shape_cast %12 : vector<8xf32> to vector<8x1xf32>
    %14 = vector.broadcast %13 : vector<8x1xf32> to vector<8x100xf32>
    %15 = arith.subf %1, %14 : vector<8x100xf32>
    %cst_6 = arith.constant 2.500000e-01 : f32
    %16 = vector.broadcast %cst_6 : f32 to vector<8x100xf32>
    %17 = arith.mulf %15, %16 : vector<8x100xf32>
    %18 = math.exp %17 : vector<8x100xf32>
    %cst_7 = arith.constant dense<0.000000e+00> : vector<8xf32>
    %19 = vector.multi_reduction <add>, %18, %cst_7 [1] : vector<8x100xf32> to vector<8xf32>
    %20 = vector.shape_cast %19 : vector<8xf32> to vector<8x1xf32>
    %21 = arith.mulf %18, %17 : vector<8x100xf32>
    %cst_8 = arith.constant dense<0.000000e+00> : vector<8xf32>
    %22 = vector.multi_reduction <add>, %21, %cst_8 [1] : vector<8x100xf32> to vector<8xf32>
    %23 = vector.shape_cast %22 : vector<8xf32> to vector<8x1xf32>
    %24 = arith.mulf %18, %7 : vector<8x100xf32>
    %cst_9 = arith.constant dense<0.000000e+00> : vector<8xf32>
    %25 = vector.multi_reduction <add>, %24, %cst_9 [1] : vector<8x100xf32> to vector<8xf32>
    %26 = vector.shape_cast %25 : vector<8xf32> to vector<8x1xf32>
    %27 = tpu.reciprocal %20 : vector<8x1xf32> -> vector<8x1xf32>
    %28 = math.log %20 : vector<8x1xf32>
    %29 = arith.subf %23, %26 : vector<8x1xf32>
    %30 = arith.mulf %29, %27 : vector<8x1xf32>
    %31 = arith.addf %30, %11 : vector<8x1xf32>
    %32 = arith.subf %31, %28 : vector<8x1xf32>
    %33 = arith.mulf %23, %27 : vector<8x1xf32>
    %34 = arith.subf %28, %33 : vector<8x1xf32>
    %35 = arith.mulf %32, %34 : vector<8x1xf32>
    %36 = vector.shape_cast %35 : vector<8x1xf32> to vector<1x8x1xf32>
    %cst_10 = arith.constant dense<0.000000e+00> : vector<1xf32>
    %37 = vector.multi_reduction <add>, %36, %cst_10 [1, 2] : vector<1x8x1xf32> to vector<1xf32>
    %38 = vector.shape_cast %37 : vector<1xf32> to vector<1x1x1xf32>
    %39 = vector.extract %38[0, 0, 0] : f32 from vector<1x1x1xf32>
    %40 = vector.broadcast %39 : f32 to vector<1x8x128xf32>
    %c0_11 = arith.constant 0 : index
    %c0_12 = arith.constant 0 : index
    %c0_13 = arith.constant 0 : index
    %41 = vector.load %arg3[%c0_11, %c0_12, %c0_13] : memref<1x8x128xf32, #tpu.memory_space<vmem>>, vector<1x8x128xf32>
    tpu.vector_store %arg3[%c0_11, %c0_12, %c0_13], %40 {strides = array<i32>} : memref<1x8x128xf32, #tpu.memory_space<vmem>>, vector<1x8x128xf32>,
    return
  }
  func.func @transform_0(%arg0: i32) -> (i32, i32) {
    %c0_i32 = arith.constant 0 : i32
    %c0_i32_0 = arith.constant 0 : i32
    return %arg0, %c0_i32 : i32, i32
  }
  func.func @transform_1(%arg0: i32) -> (i32, i32) {
    %c0_i32 = arith.constant 0 : i32
    %c0_i32_0 = arith.constant 0 : i32
    return %arg0, %c0_i32 : i32, i32
  }
  func.func @transform_2(%arg0: i32) -> (i32, i32, i32) {
    %c0_i32 = arith.constant 0 : i32
    %c0_i32_0 = arith.constant 0 : i32
    %c0_i32_1 = arith.constant 0 : i32
    return %arg0, %c0_i32, %c0_i32_0 : i32, i32, i32
  }
}

</mosaic_0001>

<bundles_post_ra>
// kernel: tpu_custom_call.1
= control target key start
LH: loop header
LB: loop body
LE: loop exit
PB: predicated region body
PF: predicated region fallthrough
CT: control target
= control target key end

     0   :  { %7 = vsyncpa [#allocation3], 0  ;;  %s255_s0 = inlined_call_operand.hbm [shape: f32[8,100], index: 0, kind: input, shape index: {}]   ;;  %s256_s1 = inlined_call_operand.hbm [shape: f32[8,100], index: 1, kind: input, shape index: {}]   ;;  %s257_s2 = inlined_call_operand.hbm [shape: f32[1,8,128], index: 2, kind: output, shape index: {}]  }
   0x1   :  { %8 = vsyncpa [#allocation6], 0 }
   0x2   :  { %9 = vsyncpa [#allocation4], 0  ;;  %s195_s9 = smov [#allocation2]   ;;  %s196_s11 = smov [#allocation5]  }
   0x3   :  { %s16_s10 = sshll.u32 %s195_s9, 4  ;;  %s26_s12 = sshll.u32 %s196_s11, 4  ;;  %s17_s10 = int_to_ptr.vmem [resolvable:$true] %s16_s10  ;;  %s27_s12 = int_to_ptr.vmem [resolvable:$true] %s26_s12 }
   0x4   :  { %s123_s15 = scalar_lea.hbm %s255_s0, 128 }
   0x5   :  { %p124_p0 = scmp.ne.s32.totalorder %s255_s0, %s123_s15  ;;  %p127_p1 = scmp.lt.u32.totalorder %s123_s15, %s255_s0 }
   0x7   :  { %p129_p2 = pnand %p127_p1, %p124_p0 }
   0x9   :  { %132 = shalt.err (!%p129_p2)
}
   0xa   :  { %s133_s20 = scalar_lea.vmem %s17_s10, 128  ;;  %p138_p4 = scmp.lt.s32.totalorder %s17_s10, %s17_s10 }
   0xb   :  { %p134_p3 = scmp.ne.s32.totalorder %s17_s10, %s133_s20  ;;  %p139_p5 = scmp.lt.s32.totalorder %s133_s20, %s133_s20 }
   0xd   :  { %p140_p6 = por %p139_p5, %p138_p4 }
   0xf   :  { %p141_p7 = pnand %p140_p6, %p134_p3 }
  0x11   :  { %144 = shalt.err (!%p141_p7)
}
  0x12   :  { %19 = dma.hbm_to_vmem [thread:$0]  %s255_s0, 128, %s17_s10, [#allocation3]  }
  0x13   :  { %s145_s25 = scalar_lea.hbm %s256_s1, 128 }
  0x14   :  { %p146_p8 = scmp.ne.s32.totalorder %s256_s1, %s145_s25  ;;  %p149_p9 = scmp.lt.u32.totalorder %s145_s25, %s256_s1 }
  0x16   :  { %p151_p10 = pnand %p149_p9, %p146_p8 }
  0x18   :  { %154 = shalt.err (!%p151_p10)
}
  0x19   :  { %s155_s30 = scalar_lea.vmem %s27_s12, 128  ;;  %p160_p12 = scmp.lt.s32.totalorder %s27_s12, %s27_s12 }
  0x1a   :  { %p156_p11 = scmp.ne.s32.totalorder %s27_s12, %s155_s30  ;;  %p161_p13 = scmp.lt.s32.totalorder %s155_s30, %s155_s30 }
  0x1c   :  { %p162_p0 = por %p161_p13, %p160_p12 }
  0x1e   :  { %p163_p1 = pnand %p162_p0, %p156_p11 }
  0x20   :  { %166 = shalt.err (!%p163_p1)
}
  0x21   :  { %29 = dma.hbm_to_vmem [thread:$0]  %s256_s1, 128, %s27_s12, [#allocation6]  }
  0x22   :  { %189 = dma.done.wait [#allocation3], 128  }
  0x23   :  { %190 = vsyncadd [#allocation3], 4294967168 }
  0x24   :  { %191 = dma.done.wait [#allocation6], 128  }
  0x25   :  { %192 = vsyncadd [#allocation6], 4294967168  ;;  %vm38_vm0 = vcmask 818176   ;;  %v36_v0 = vld [vmem:[#allocation2] sm:$0xff]  ;;  %v37_v1 = vld [vmem:[#allocation5] sm:$0xff]  ;;  %vm79_vm1 = vcmask 7168  }
  0x26   :  { %v39_v2 = vsel %vm38_vm0, %v36_v0, -inf  ;;  %v51_v3 = vsel %vm38_vm0, %v37_v1, -inf  ;;  %s197_s1 = smov [#allocation7]  }
  0x27   :  { %40 = vmax.xlane.f32.xlu0 %v39_v2  ;;  %s98_s4 = sshll.u32 %s197_s1, 4  ;;  %s99_s4 = int_to_ptr.vmem [resolvable:$true] %s98_s4 }
  0x28   :  { %s167_s6 = scalar_lea.vmem %s99_s4, 128  ;;  %p172_p3 = scmp.lt.s32.totalorder %s99_s4, %s99_s4 }
  0x29   :  { %p168_p2 = scmp.ne.s32.totalorder %s99_s4, %s167_s6  ;;  %p173_p4 = scmp.lt.s32.totalorder %s167_s6, %s167_s6 }
  0x2b   :  { %52 = vmax.xlane.f32.xlu0 %v51_v3  ;;  %p174_p5 = por %p173_p4, %p172_p3 }
  0x2d   :  { %p175_p6 = pnand %p174_p5, %p168_p2 }
  0xb4   :  { %v41_v4 = vpop.xlane.xlu0 %40 }
  0xb5   :  { %v42_v5 = vsub.f32 %v36_v0, %v41_v4 }
  0xb7   :  { %v43_v6 = vmul.f32 0.25, %v42_v5 }
  0xb8   :  { %v53_v7 = vpop.xlane.xlu0 %52 }
  0xb9   :  { %v44_v8 = vmul.f32 1.442695, %v43_v6  ;;  %v54_v9 = vsub.f32 %v37_v1, %v53_v7 }
  0xbb   :  { %113 = vpow2.f32 %v44_v8  ;;  %v55_v10 = vmul.f32 0.25, %v54_v9 }
  0xbd   :  { %v56_v11 = vmul.f32 1.442695, %v55_v10 }
  0xbf   :  { %115 = vpow2.f32 %v56_v11 }
  0xc5   :  { %v114_v12 = vpop.eup %113 }
  0xc6   :  { %v46_v13 = vsel %vm38_vm0, %v114_v12, 0.0 }
  0xc7   :  { %47 = vadd.xlane.f32.xlu1 %v46_v13 }
  0xc9   :  { %v116_v14 = vpop.eup %115 }
  0xca   :  { %v58_v15 = vsel %vm38_vm0, %v116_v14, 0.0  ;;  %v61_v16 = vmul.f32 %v116_v14, %v55_v10  ;;  %v65_v17 = vmul.f32 %v116_v14, %v43_v6 }
  0xcb   :  { %59 = vadd.xlane.f32.xlu1 %v58_v15 }
  0xcc   :  { %v62_v18 = vsel %vm38_vm0, %v61_v16, 0.0  ;;  %v66_v19 = vsel %vm38_vm0, %v65_v17, 0.0 }
  0xcd   :  { %63 = vadd.xlane.f32.xlu0 %v62_v18 }
  0xcf   :  { %67 = vadd.xlane.f32.xlu1 %v66_v19 }
 0x154   :  { %v48_v20 = vpop.xlane.xlu1 %47 }
 0x155   :  { %117 = vlog2.f32 %v48_v20 }
 0x158   :  { %v60_v21 = vpop.xlane.xlu1 %59 }
 0x159   :  { %119 = vrcp.f32 %v60_v21 }
 0x15a   :  { %121 = vlog2.f32 %v60_v21  ;;  %v64_v24 = vpop.xlane.xlu0 %63 }
 0x15c   :  { %v68_v22 = vpop.xlane.xlu1 %67 }
 0x15d   :  { %v72_v25 = vsub.f32 %v64_v24, %v68_v22 }
 0x15f   :  { %v118_v23 = vpop.eup %117 }
 0x160   :  { %v50_v28 = vmul.f32 0.6931472, %v118_v23 }
 0x163   :  { %v120_v26 = vpop.eup %119 }
 0x164   :  { %v122_v27 = vpop.eup %121  ;;  %v76_v29 = vmul.f32 %v120_v26, %v64_v24  ;;  %v73_v30 = vmul.f32 %v120_v26, %v72_v25 }
 0x165   :  { %v71_v31 = vmul.f32 0.6931472, %v122_v27 }
 0x166   :  { %v74_v32 = vadd.f32 %v73_v30, %v50_v28 }
 0x167   :  { %v77_v33 = vsub.f32 %v71_v31, %v76_v29 }
 0x168   :  { %v75_v34 = vsub.f32 %v74_v32, %v71_v31 }
 0x16a   :  { %v78_v35 = vmul.f32 %v77_v33, %v75_v34 }
 0x16c   :  { %v80_v36 = vsel %vm79_vm1, %v78_v35, 0.0 }
 0x16d   :  { %81 = vadd.xlane.f32.xlu0 %v80_v36 }
 0x1fa   :  { %v82_v37 = vpop.xlane.xlu0 %81 }
 0x1fb   :  { %v83_v38 = vrot.slane %v82_v37, 4 }
 0x1fd   :  { %v84_v39 = vadd.f32 %v83_v38, %v82_v37 }
 0x1ff   :  { %v85_v40 = vrot.slane %v84_v39, 2 }
 0x201   :  { %v86_v41 = vadd.f32 %v85_v40, %v84_v39 }
 0x203   :  { %v87_v42 = vrot.slane %v86_v41, 1 }
 0x205   :  { %v88_v43 = vadd.f32 %v87_v42, %v86_v41 }
 0x207   :  { %108 = vpush %v88_v43 }
 0x238   :  { %s109_s5 = spop %108 }
 0x239   :  { %v90_v44 = vstv %s109_s5 }
 0x23a   :  { %91 = vst [vmem:[#allocation7] sm:$0xff] %v90_v44 }
 0x23b   :  { %178 = shalt.err (!%p175_p6)
}
 0x23c   :  { %s179_s9 = scalar_lea.hbm %s257_s2, 128 }
 0x23d   :  { %p180_p7 = scmp.ne.s32.totalorder %s257_s2, %s179_s9  ;;  %p183_p8 = scmp.lt.u32.totalorder %s179_s9, %s257_s2 }
 0x23f   :  { %p185_p9 = pnand %p183_p8, %p180_p7 }
 0x241   :  { %188 = shalt.err (!%p185_p9)
}
 0x242   :  { %101 = dma.vmem_to_hbm [thread:$0]  %s99_s4, 128, %s257_s2, [#allocation4]  }
 0x243   :  { %193 = dma.done.wait [#allocation4], 128  }
 0x244   :  { %194 = vsyncadd [#allocation4], 4294967168 }
 0x245   :  { %105 = vsyncpa [#allocation3], 1 }
 0x246   :  { %106 = vsyncpa [#allocation6], 1 }
 0x247   :  { %107 = vsyncpa [#allocation4], 1 }

</bundles_post_ra>
